<compile_context>
chip_gen: v5e
topology: v5e:2x2
jax: 0.10.0
libtpu: 0.0.40
codegen_flags: <defaults>
</compile_context>

<pallas_src>
import functools

import jax
import jax.numpy as jnp
from jax.experimental import pallas as pl
from jax.experimental.pallas import tpu as pltpu


# --------------------------------------------------------------------------
# Kernels
# --------------------------------------------------------------------------

def _attention_gate_kernel_mxu(x_ref, g_ref, wx_ref, wg_ref, bxg_ref,
                               wpsi_ref, bpsi_ref, o_ref, *, eps):
    """MXU path (C > 8). Blocks: x/g/o (1,C,T); wx/wg (C,C) bf16;
    bxg (C,1) f32; wpsi' (1,C) f32; bpsi' scalar in SMEM."""
    x = x_ref[0]                                      # (C, T) original dtype
    g = g_ref[0]

    # 1x1 convs == channel matmuls; bf16 operands, f32 accumulation (no
    # Precision.HIGHEST -> single MXU pass). Cast is a no-op for bf16 inputs.
    xc = jnp.dot(wx_ref[...], x.astype(jnp.bfloat16),
                 preferred_element_type=jnp.float32)              # (C, T) f32
    gc = jnp.dot(wg_ref[...], g.astype(jnp.bfloat16),
                 preferred_element_type=jnp.float32)              # (C, T) f32

    att = jnp.maximum(xc + gc + bxg_ref[...], 0.0)                # relu

    # LayerNorm statistics over channels (sublane axis).
    mean = jnp.mean(att, axis=0, keepdims=True)                   # (1, T)
    cent = att - mean
    var = jnp.mean(cent * cent, axis=0, keepdims=True)            # (1, T)

    # gamma/beta already folded into wpsi'/bpsi' in the wrapper.
    s = jnp.dot(wpsi_ref[...], cent,
                preferred_element_type=jnp.float32)               # (1, T)
    gate = jax.nn.sigmoid(s * jax.lax.rsqrt(var + eps) + bpsi_ref[0])

    o_ref[0] = (gate * x).astype(o_ref.dtype)


def _attention_gate_kernel_vpu(x_ref, g_ref, wx_ref, wg_ref, bxg_ref,
                               wpsi_ref, bpsi_ref, o_ref, *, eps):
    """Small-C path (C <= 8): unrolled VPU outer-product FMAs, no MXU.
    wx/wg (C,C) f32; bxg (C,1) f32; wpsi' (C,1) f32; bpsi' scalar in SMEM."""
    C = x_ref.shape[1]
    xf = x_ref[0].astype(jnp.float32)                 # (C, T)
    gf = g_ref[0].astype(jnp.float32)

    # xc + gc + bxg, unrolled over the C input channels (C <= 8).
    acc = (wx_ref[:, 0:1] * xf[0:1, :] + wg_ref[:, 0:1] * gf[0:1, :]
           + bxg_ref[...])                                        # (C, T)
    for c in range(1, C):
        acc = acc + wx_ref[:, c:c + 1] * xf[c:c + 1, :] \
                  + wg_ref[:, c:c + 1] * gf[c:c + 1, :]

    att = jnp.maximum(acc, 0.0)

    # LayerNorm stats over channels. NOTE: axis-0 reductions on a logical
    # (C,T) block with C < 8 are masked correctly by Mosaic (verified at C=4).
    mean = jnp.mean(att, axis=0, keepdims=True)                   # (1, T)
    cent = att - mean
    var = jnp.mean(cent * cent, axis=0, keepdims=True)            # (1, T)

    # psi with gamma/beta folded: weighted sublane reduction, no MXU.
    s = jnp.sum(wpsi_ref[...] * cent, axis=0, keepdims=True)      # (1, T)
    gate = jax.nn.sigmoid(s * jax.lax.rsqrt(var + eps) + bpsi_ref[0])

    o_ref[0] = (gate * xf).astype(o_ref.dtype)


# --------------------------------------------------------------------------
# Tiling
# --------------------------------------------------------------------------

_LANE = 128
_MAX_TILE_LANES = 4096
_VMEM_TILE_BUDGET = 24 * 1024 * 1024     # bytes the spatial tiling may use


def _cdiv(a, b):
    return -(-a // b)


def _pick_hw_tile(hw, c, in_itemsize, batch):
    """Largest lane-dense (multiple-of-128) spatial tile that fits the VMEM
    budget with double-buffered I/O + f32 temporaries, while keeping enough
    grid steps for pipelining / both v7x TensorCores."""
    if hw <= _LANE:
        return hw                         # full extent (block dim == array dim)
    hw_blocks = _cdiv(hw, _LANE)
    # Per 128-lane column: 3 I/O streams x 2 buffers + ~6 f32 (C,128) temps.
    per_block = (3 * 2 * in_itemsize + 6 * 4) * c * _LANE
    weights = 2 * (2 * c * c + 4 * c) * 4
    t_blocks = max(1, min(hw_blocks,
                          _MAX_TILE_LANES // _LANE,
                          max(1, _VMEM_TILE_BUDGET - weights) // per_block))
    # Prefer >= 8 grid steps (pipeline depth + megacore balance).
    while t_blocks > 1 and batch * _cdiv(hw_blocks, t_blocks) < 8:
        t_blocks //= 2
    return t_blocks * _LANE


# --------------------------------------------------------------------------
# Wrapper
# --------------------------------------------------------------------------

def attention_gate(x, g, wx, wg, bxg, gamma, beta, wpsi, bpsi, *, eps=1e-5):
    """Pallas implementation of AttentionGate.forward.

    x, g:         (B, C, H, W)  NCHW, as in PyTorch.
    wx, wg:       (C, C)  conv_x / conv_g weights (conv.weight[:, :, 0, 0]).
    bxg:          (C,)    extra per-channel bias.
    gamma, beta:  (C,)    LayerNorm affine parameters.
    wpsi:         (C,)    psi conv weight (psi.weight[0, :, 0, 0]).
    bpsi:         ()/(1,) scalar bias.
    """
    B, C, H, W = x.shape
    assert g.shape == x.shape and g.dtype == x.dtype
    HW = H * W
    itemsize = jnp.dtype(x.dtype).itemsize
    T = _pick_hw_tile(HW, C, itemsize, B)
    grid = (B, _cdiv(HW, T))

    # Free, contiguous reshape: collapse spatial dims into a lane-dense last dim.
    x3 = x.reshape(B, C, HW)
    g3 = g.reshape(B, C, HW)

    f32 = jnp.float32
    bxg2 = bxg.reshape(C, 1).astype(f32)
    # Fold LayerNorm affine into the psi projection (exact algebra):
    #   w' = wpsi * gamma,  b' = dot(wpsi, beta) + bpsi
    wprime = (wpsi.astype(f32) * gamma.astype(f32))
    bprime = (jnp.dot(wpsi.astype(f32), beta.astype(f32))
              + jnp.asarray(bpsi, f32).reshape(())).reshape(1).astype(f32)

    use_mxu = C > 8
    if use_mxu:
        kern = functools.partial(_attention_gate_kernel_mxu, eps=eps)
        wx_p = wx.astype(jnp.bfloat16)          # bf16 MXU operands, f32 accum
        wg_p = wg.astype(jnp.bfloat16)
        wpsi_p = wprime.reshape(1, C)
    else:
        kern = functools.partial(_attention_gate_kernel_vpu, eps=eps)
        wx_p = wx.astype(f32)                   # VPU path stays f32
        wg_p = wg.astype(f32)
        wpsi_p = wprime.reshape(C, 1)

    xg_spec = pl.BlockSpec((1, C, T), lambda b, s: (b, 0, s))

    def param_spec(shape):
        return pl.BlockSpec(shape, lambda b, s: (0, 0))

    out = pl.pallas_call(
        kern,
        out_shape=jax.ShapeDtypeStruct((B, C, HW), x.dtype),
        grid=grid,
        in_specs=[
            xg_spec,                                             # x
            xg_spec,                                             # g
            param_spec((C, C)),                                  # wx
            param_spec((C, C)),                                  # wg
            param_spec((C, 1)),                                  # bxg
            param_spec(wpsi_p.shape),                            # wpsi' (folded)
            pl.BlockSpec(memory_space=pltpu.MemorySpace.SMEM),   # bpsi' scalar
        ],
        out_specs=pl.BlockSpec((1, C, T), lambda b, s: (b, 0, s)),
        compiler_params=pltpu.CompilerParams(
            dimension_semantics=("parallel", "parallel"),
            vmem_limit_bytes=48 * 1024 * 1024),
    )(x3, g3, wx_p, wg_p, bxg2, wpsi_p, bprime)

    return out.reshape(B, C, H, W)


# --------------------------------------------------------------------------
# Pure-JAX reference (matches the PyTorch module)
# --------------------------------------------------------------------------

def _reference(x, g, wx, wg, bxg, gamma, beta, wpsi, bpsi, eps=1e-5):
    hi = jax.lax.Precision.HIGHEST
    xc = jnp.einsum('oc,bchw->bohw', wx, x, precision=hi)
    gc = jnp.einsum('oc,bchw->bohw', wg, g, precision=hi)
    att = jax.nn.relu(xc + gc + bxg[None, :, None, None])
    a = jnp.transpose(att, (0, 2, 3, 1))                       # NHWC
    mean = a.mean(-1, keepdims=True)
    var = ((a - mean) ** 2).mean(-1, keepdims=True)
    a = (a - mean) / jnp.sqrt(var + eps) * gamma + beta
    att = jnp.transpose(a, (0, 3, 1, 2))                       # NCHW
    psi = jnp.einsum('c,bchw->bhw', wpsi, att, precision=hi)[:, None] + bpsi
    return jax.nn.sigmoid(psi) * x


def _make_inputs(key, B, C, H, W):
    ks = jax.random.split(key, 8)
    x = jax.random.normal(ks[0], (B, C, H, W), dtype=jnp.float32)
    g = jax.random.normal(ks[1], (B, C, H, W), dtype=jnp.float32)
    wx = jax.random.normal(ks[2], (C, C), dtype=jnp.float32) / jnp.sqrt(C)
    wg = jax.random.normal(ks[3], (C, C), dtype=jnp.float32) / jnp.sqrt(C)
    wpsi = jax.random.normal(ks[4], (C,), dtype=jnp.float32) / jnp.sqrt(C)
    bxg = 0.1 * jax.random.normal(ks[5], (C,), dtype=jnp.float32)
    gamma = 1.0 + 0.1 * jax.random.normal(ks[6], (C,), dtype=jnp.float32)
    beta = 0.1 * jax.random.normal(ks[7], (C,), dtype=jnp.float32)
    bpsi = jnp.float32(0.05)
    return x, g, wx, wg, bxg, gamma, beta, wpsi, bpsi


if __name__ == "__main__":
    B, H, W = 2, 16, 16

    # --- Small-C config (filters=4): exercises the f32 VPU path. ---
    args = _make_inputs(jax.random.PRNGKey(0), B, 4, H, W)
    out = jax.block_until_ready(attention_gate(*args))
    ref = _reference(*args)
    assert out.shape == (B, 4, H, W)
    assert jnp.allclose(out, ref, rtol=1e-4, atol=1e-4), float(
        jnp.max(jnp.abs(out - ref)))

    # --- Larger-C config (filters=32): exercises the bf16 MXU path.
    # Looser tolerance is expected: channel matmuls deliberately run in bf16
    # with f32 accumulation (vs. the f32 HIGHEST reference).
    args2 = _make_inputs(jax.random.PRNGKey(1), B, 32, H, W)
    out2 = jax.block_until_ready(attention_gate(*args2))
    ref2 = _reference(*args2)
    assert out2.shape == (B, 32, H, W)
    assert jnp.allclose(out2, ref2, rtol=1e-1, atol=1e-1), float(
        jnp.max(jnp.abs(out2 - ref2)))

    print("KERNEL_OK")
</pallas_src>

<mosaic_0001>
module attributes {stable_mosaic.version = 11 : i64} {
  func.func @_attention_gate_kernel_vpu(%arg0: i32, %arg1: i32, %arg2: memref<1x4x128xf32, #tpu.memory_space<vmem>>, %arg3: memref<1x4x128xf32, #tpu.memory_space<vmem>>, %arg4: memref<4x4xf32, #tpu.memory_space<vmem>>, %arg5: memref<4x4xf32, #tpu.memory_space<vmem>>, %arg6: memref<4x1xf32, #tpu.memory_space<vmem>>, %arg7: memref<4x1xf32, #tpu.memory_space<vmem>>, %arg8: memref<1xf32, #tpu.memory_space<smem>>, %arg9: memref<1x4x128xf32, #tpu.memory_space<vmem>>) attributes {dimension_semantics = [#tpu.dimension_semantics<parallel>, #tpu.dimension_semantics<parallel>], iteration_bounds = array<i64: 2, 2>, scalar_prefetch = 0 : i64, scratch_operands = 0 : i64, tpu.core_type = #tpu.core_type<tc>, window_params = [{transform_indices = @transform_0, window_bounds = array<i64: 1, 4, 128>}, {transform_indices = @transform_1, window_bounds = array<i64: 1, 4, 128>}, {pipeline_mode = #tpu.pipeline_mode<synchronous>, transform_indices = @transform_2, window_bounds = array<i64: 4, 4>}, {pipeline_mode = #tpu.pipeline_mode<synchronous>, transform_indices = @transform_3, window_bounds = array<i64: 4, 4>}, {pipeline_mode = #tpu.pipeline_mode<synchronous>, transform_indices = @transform_4, window_bounds = array<i64: 4, 1>}, {pipeline_mode = #tpu.pipeline_mode<synchronous>, transform_indices = @transform_5, window_bounds = array<i64: 4, 1>}, {transform_indices = @transform_6, window_bounds = array<i64: 1>}, {transform_indices = @transform_7, window_bounds = array<i64: 1, 4, 128>}]} {
    %c0 = arith.constant 0 : index
    %c0_0 = arith.constant 0 : index
    %c0_1 = arith.constant 0 : index
    %0 = vector.load %arg2[%c0, %c0_0, %c0_1] : memref<1x4x128xf32, #tpu.memory_space<vmem>>, vector<1x4x128xf32>
    %1 = vector.shape_cast %0 : vector<1x4x128xf32> to vector<4x128xf32>
    %c0_2 = arith.constant 0 : index
    %c0_3 = arith.constant 0 : index
    %c0_4 = arith.constant 0 : index
    %2 = vector.load %arg3[%c0_2, %c0_3, %c0_4] : memref<1x4x128xf32, #tpu.memory_space<vmem>>, vector<1x4x128xf32>
    %3 = vector.shape_cast %2 : vector<1x4x128xf32> to vector<4x128xf32>
    %c0_5 = arith.constant 0 : index
    %c0_6 = arith.constant 0 : index
    %4 = vector.load %arg4[%c0_5, %c0_6] : memref<4x4xf32, #tpu.memory_space<vmem>>, vector<4x1xf32>
    %5 = vector.extract_strided_slice %1 {offsets = [0, 0], sizes = [1, 128], strides = [1, 1]} : vector<4x128xf32> to vector<1x128xf32>
    %6 = vector.broadcast %4 : vector<4x1xf32> to vector<4x128xf32>
    %7 = vector.broadcast %5 : vector<1x128xf32> to vector<4x128xf32>
    %8 = arith.mulf %6, %7 : vector<4x128xf32>
    %c0_7 = arith.constant 0 : index
    %c0_8 = arith.constant 0 : index
    %9 = vector.load %arg5[%c0_7, %c0_8] : memref<4x4xf32, #tpu.memory_space<vmem>>, vector<4x1xf32>
    %10 = vector.extract_strided_slice %3 {offsets = [0, 0], sizes = [1, 128], strides = [1, 1]} : vector<4x128xf32> to vector<1x128xf32>
    %11 = vector.broadcast %9 : vector<4x1xf32> to vector<4x128xf32>
    %12 = vector.broadcast %10 : vector<1x128xf32> to vector<4x128xf32>
    %13 = arith.mulf %11, %12 : vector<4x128xf32>
    %14 = arith.addf %8, %13 : vector<4x128xf32>
    %c0_9 = arith.constant 0 : index
    %c0_10 = arith.constant 0 : index
    %15 = vector.load %arg6[%c0_9, %c0_10] : memref<4x1xf32, #tpu.memory_space<vmem>>, vector<4x1xf32>
    %16 = vector.broadcast %15 : vector<4x1xf32> to vector<4x128xf32>
    %17 = arith.addf %14, %16 : vector<4x128xf32>
    %c0_11 = arith.constant 0 : index
    %c1 = arith.constant 1 : index
    %18 = vector.load %arg4[%c0_11, %c1] : memref<4x4xf32, #tpu.memory_space<vmem>>, vector<4x1xf32>
    %19 = vector.extract_strided_slice %1 {offsets = [1, 0], sizes = [1, 128], strides = [1, 1]} : vector<4x128xf32> to vector<1x128xf32>
    %20 = vector.broadcast %18 : vector<4x1xf32> to vector<4x128xf32>
    %21 = vector.broadcast %19 : vector<1x128xf32> to vector<4x128xf32>
    %22 = arith.mulf %20, %21 : vector<4x128xf32>
    %23 = arith.addf %17, %22 : vector<4x128xf32>
    %c0_12 = arith.constant 0 : index
    %c1_13 = arith.constant 1 : index
    %24 = vector.load %arg5[%c0_12, %c1_13] : memref<4x4xf32, #tpu.memory_space<vmem>>, vector<4x1xf32>
    %25 = vector.extract_strided_slice %3 {offsets = [1, 0], sizes = [1, 128], strides = [1, 1]} : vector<4x128xf32> to vector<1x128xf32>
    %26 = vector.broadcast %24 : vector<4x1xf32> to vector<4x128xf32>
    %27 = vector.broadcast %25 : vector<1x128xf32> to vector<4x128xf32>
    %28 = arith.mulf %26, %27 : vector<4x128xf32>
    %29 = arith.addf %23, %28 : vector<4x128xf32>
    %c0_14 = arith.constant 0 : index
    %c2 = arith.constant 2 : index
    %30 = vector.load %arg4[%c0_14, %c2] : memref<4x4xf32, #tpu.memory_space<vmem>>, vector<4x1xf32>
    %31 = vector.extract_strided_slice %1 {offsets = [2, 0], sizes = [1, 128], strides = [1, 1]} : vector<4x128xf32> to vector<1x128xf32>
    %32 = vector.broadcast %30 : vector<4x1xf32> to vector<4x128xf32>
    %33 = vector.broadcast %31 : vector<1x128xf32> to vector<4x128xf32>
    %34 = arith.mulf %32, %33 : vector<4x128xf32>
    %35 = arith.addf %29, %34 : vector<4x128xf32>
    %c0_15 = arith.constant 0 : index
    %c2_16 = arith.constant 2 : index
    %36 = vector.load %arg5[%c0_15, %c2_16] : memref<4x4xf32, #tpu.memory_space<vmem>>, vector<4x1xf32>
    %37 = vector.extract_strided_slice %3 {offsets = [2, 0], sizes = [1, 128], strides = [1, 1]} : vector<4x128xf32> to vector<1x128xf32>
    %38 = vector.broadcast %36 : vector<4x1xf32> to vector<4x128xf32>
    %39 = vector.broadcast %37 : vector<1x128xf32> to vector<4x128xf32>
    %40 = arith.mulf %38, %39 : vector<4x128xf32>
    %41 = arith.addf %35, %40 : vector<4x128xf32>
    %c0_17 = arith.constant 0 : index
    %c3 = arith.constant 3 : index
    %42 = vector.load %arg4[%c0_17, %c3] : memref<4x4xf32, #tpu.memory_space<vmem>>, vector<4x1xf32>
    %43 = vector.extract_strided_slice %1 {offsets = [3, 0], sizes = [1, 128], strides = [1, 1]} : vector<4x128xf32> to vector<1x128xf32>
    %44 = vector.broadcast %42 : vector<4x1xf32> to vector<4x128xf32>
    %45 = vector.broadcast %43 : vector<1x128xf32> to vector<4x128xf32>
    %46 = arith.mulf %44, %45 : vector<4x128xf32>
    %47 = arith.addf %41, %46 : vector<4x128xf32>
    %c0_18 = arith.constant 0 : index
    %c3_19 = arith.constant 3 : index
    %48 = vector.load %arg5[%c0_18, %c3_19] : memref<4x4xf32, #tpu.memory_space<vmem>>, vector<4x1xf32>
    %49 = vector.extract_strided_slice %3 {offsets = [3, 0], sizes = [1, 128], strides = [1, 1]} : vector<4x128xf32> to vector<1x128xf32>
    %50 = vector.broadcast %48 : vector<4x1xf32> to vector<4x128xf32>
    %51 = vector.broadcast %49 : vector<1x128xf32> to vector<4x128xf32>
    %52 = arith.mulf %50, %51 : vector<4x128xf32>
    %53 = arith.addf %47, %52 : vector<4x128xf32>
    %cst = arith.constant 0.000000e+00 : f32
    %54 = vector.broadcast %cst : f32 to vector<4x128xf32>
    %55 = arith.maximumf %53, %54 : vector<4x128xf32>
    %cst_20 = arith.constant dense<0.000000e+00> : vector<128xf32>
    %56 = vector.multi_reduction <add>, %55, %cst_20 [0] : vector<4x128xf32> to vector<128xf32>
    %57 = vector.shape_cast %56 : vector<128xf32> to vector<1x128xf32>
    %cst_21 = arith.constant 4.000000e+00 : f32
    %58 = vector.broadcast %cst_21 : f32 to vector<1x128xf32>
    %59 = arith.divf %57, %58 : vector<1x128xf32>
    %60 = vector.broadcast %59 : vector<1x128xf32> to vector<4x128xf32>
    %61 = arith.subf %55, %60 : vector<4x128xf32>
    %62 = arith.mulf %61, %61 : vector<4x128xf32>
    %cst_22 = arith.constant dense<0.000000e+00> : vector<128xf32>
    %63 = vector.multi_reduction <add>, %62, %cst_22 [0] : vector<4x128xf32> to vector<128xf32>
    %64 = vector.shape_cast %63 : vector<128xf32> to vector<1x128xf32>
    %cst_23 = arith.constant 4.000000e+00 : f32
    %65 = vector.broadcast %cst_23 : f32 to vector<1x128xf32>
    %66 = arith.divf %64, %65 : vector<1x128xf32>
    %c0_24 = arith.constant 0 : index
    %c0_25 = arith.constant 0 : index
    %67 = vector.load %arg7[%c0_24, %c0_25] : memref<4x1xf32, #tpu.memory_space<vmem>>, vector<4x1xf32>
    %68 = vector.broadcast %67 : vector<4x1xf32> to vector<4x128xf32>
    %69 = arith.mulf %68, %61 : vector<4x128xf32>
    %cst_26 = arith.constant dense<0.000000e+00> : vector<128xf32>
    %70 = vector.multi_reduction <add>, %69, %cst_26 [0] : vector<4x128xf32> to vector<128xf32>
    %71 = vector.shape_cast %70 : vector<128xf32> to vector<1x128xf32>
    %cst_27 = arith.constant 9.99999974E-6 : f32
    %72 = vector.broadcast %cst_27 : f32 to vector<1x128xf32>
    %73 = arith.addf %66, %72 : vector<1x128xf32>
    %74 = math.rsqrt %73 : vector<1x128xf32>
    %75 = arith.mulf %71, %74 : vector<1x128xf32>
    %c0_28 = arith.constant 0 : index
    %76 = memref.load %arg8[%c0_28] : memref<1xf32, #tpu.memory_space<smem>>
    %77 = vector.broadcast %76 : f32 to vector<1x128xf32>
    %78 = arith.addf %75, %77 : vector<1x128xf32>
    %79 = arith.negf %78 : vector<1x128xf32>
    %80 = math.exp %79 : vector<1x128xf32>
    %cst_29 = arith.constant 1.000000e+00 : f32
    %81 = vector.broadcast %cst_29 : f32 to vector<1x128xf32>
    %82 = arith.addf %81, %80 : vector<1x128xf32>
    %83 = arith.divf %81, %82 : vector<1x128xf32>
    %84 = vector.broadcast %83 : vector<1x128xf32> to vector<4x128xf32>
    %85 = arith.mulf %84, %1 : vector<4x128xf32>
    %c0_30 = arith.constant 0 : index
    %c0_31 = arith.constant 0 : index
    %c0_32 = arith.constant 0 : index
    %86 = vector.load %arg9[%c0_30, %c0_31, %c0_32] : memref<1x4x128xf32, #tpu.memory_space<vmem>>, vector<1x4x128xf32>
    %87 = vector.shape_cast %86 : vector<1x4x128xf32> to vector<4x128xf32>
    %88 = vector.shape_cast %85 : vector<4x128xf32> to vector<1x4x128xf32>
    tpu.vector_store %arg9[%c0_30, %c0_31, %c0_32], %88 {strides = array<i32>} : memref<1x4x128xf32, #tpu.memory_space<vmem>>, vector<1x4x128xf32>,
    return
  }
  func.func @transform_0(%arg0: i32, %arg1: i32) -> (i32, i32, i32) {
    %c0_i32 = arith.constant 0 : i32
    %c0_i32_0 = arith.constant 0 : i32
    return %arg0, %c0_i32, %arg1 : i32, i32, i32
  }
  func.func @transform_1(%arg0: i32, %arg1: i32) -> (i32, i32, i32) {
    %c0_i32 = arith.constant 0 : i32
    %c0_i32_0 = arith.constant 0 : i32
    return %arg0, %c0_i32, %arg1 : i32, i32, i32
  }
  func.func @transform_2(%arg0: i32, %arg1: i32) -> (i32, i32) {
    %c0_i32 = arith.constant 0 : i32
    %c0_i32_0 = arith.constant 0 : i32
    %c0_i32_1 = arith.constant 0 : i32
    return %c0_i32, %c0_i32_0 : i32, i32
  }
  func.func @transform_3(%arg0: i32, %arg1: i32) -> (i32, i32) {
    %c0_i32 = arith.constant 0 : i32
    %c0_i32_0 = arith.constant 0 : i32
    %c0_i32_1 = arith.constant 0 : i32
    return %c0_i32, %c0_i32_0 : i32, i32
  }
  func.func @transform_4(%arg0: i32, %arg1: i32) -> (i32, i32) {
    %c0_i32 = arith.constant 0 : i32
    %c0_i32_0 = arith.constant 0 : i32
    %c0_i32_1 = arith.constant 0 : i32
    return %c0_i32, %c0_i32_0 : i32, i32
  }
  func.func @transform_5(%arg0: i32, %arg1: i32) -> (i32, i32) {
    %c0_i32 = arith.constant 0 : i32
    %c0_i32_0 = arith.constant 0 : i32
    %c0_i32_1 = arith.constant 0 : i32
    return %c0_i32, %c0_i32_0 : i32, i32
  }
  func.func @transform_6(%arg0: i32, %arg1: i32) -> i32 {
    %c0_i32 = arith.constant 0 : i32
    %c0_i32_0 = arith.constant 0 : i32
    return %c0_i32 : i32
  }
  func.func @transform_7(%arg0: i32, %arg1: i32) -> (i32, i32, i32) {
    %c0_i32 = arith.constant 0 : i32
    %c0_i32_0 = arith.constant 0 : i32
    return %arg0, %c0_i32, %arg1 : i32, i32, i32
  }
}

</mosaic_0001>

<bundles_post_ra>
// kernel: tpu_custom_call.1
= control target key start
LH: loop header
LB: loop body
LE: loop exit
PB: predicated region body
PF: predicated region fallthrough
CT: control target
= control target key end

     0   :  { %s1158_s0 = inlined_call_operand.hbm [shape: f32[2,4,256], index: 0, kind: input, shape index: {}]   ;;  %s1159_s1 = inlined_call_operand.hbm [shape: f32[2,4,256], index: 1, kind: input, shape index: {}]   ;;  %s1160_s2 = inlined_call_operand.vmem [shape: f32[4,4], index: 2, kind: input, shape index: {}]   ;;  %s1161_s3 = inlined_call_operand.vmem [shape: f32[4,4], index: 3, kind: input, shape index: {}]   ;;  %s1162_s4 = inlined_call_operand.vmem [shape: f32[4,1], index: 4, kind: input, shape index: {}]   ;;  %s1163_s5 = inlined_call_operand.vmem [shape: f32[4,1], index: 5, kind: input, shape index: {}]   ;;  %s1164_s6 = inlined_call_operand.<no memory space> [shape: f32[1], index: 6, kind: input, shape index: {}]   ;;  %s1165_s7 = inlined_call_operand.hbm [shape: f32[2,4,256], index: 7, kind: output, shape index: {}]  }
   0x1   :  { %1170 = sst [smem:[#allocation16_spill]] %s1158_s0 }
   0x2   :  { %12 = sst [smem:[#allocation2]] %s1164_s6 }
   0x3   :  { %13 = vsyncpa [#allocation4], 0 }
   0x4   :  { %15 = vsyncpa [#allocation4 + $0x1], 0 }
   0x5   :  { %16 = vsyncpa [#allocation7], 0 }
   0x6   :  { %18 = vsyncpa [#allocation7 + $0x1], 0 }
   0x7   :  { %19 = vsyncpa [#allocation5], 0 }
   0x8   :  { %21 = vsyncpa [#allocation5 + $0x1], 0  ;;  %s969_s26 = smov 0   ;;  %s971_s27 = smov 0  }
   0x9   :  { %s973_s28 = smov 0   ;;  %s975_s29 = smov 0  }
   0xa   :  { %s977_s30 = smov 0   ;;  %s979_s8 = smov 0  }
   0xb   :  { %s981_s9 = smov 0   ;;  %s983_s6 = smov 0  }
   0xc LB: > { %1171 = sst [smem:[#allocation12_spill]] %s891_s26  ;;  %s631_s10 = sadd.s32 4294967295, %s919_s6   ;;  %s919_s6 = sphi %s983_s6, %s27_s6   ;;  %s915_s9 = sphi %s981_s9, %s1184_s9   ;;  %s911_s8 = sphi %s979_s8, %s1189_s8   ;;  %s907_s30 = sphi %s977_s30, %s1182_s30   ;;  %s903_s29 = sphi %s975_s29, %s1188_s29   ;;  %s899_s28 = sphi %s973_s28, %s1187_s28   ;;  %s895_s27 = sphi %s971_s27, %s1186_s27   ;;  %s891_s26 = sphi %s969_s26, %s1185_s26  }
   0xd   : > { %1172 = sst [smem:[#allocation13_spill]] %s915_s9  ;;  %s632_s11 = sadd.s32 4294967294, %s919_s6  }
   0xe   : > { %s36_s12 = sadd.s32 1, %s911_s8  ;;  %s39_s13 = sadd.s32 1, %s915_s9 }
   0xf   : > { %p37_p0 = scmp.ge.s32.totalorder %s36_s12, 2  ;;  %s48_s14 = sadd.s32 1, %s899_s28 }
  0x10   : > { %p55_p1 = scmp.ne.s32.totalorder %s899_s28, %s895_s27  ;;  %p56_p2 = scmp.eq.s32.totalorder %s919_s6, 0 }
  0x11   : > { %s1191_s12 = smov (%p37_p0, %s36_s12), 0  ;;  %s1193_s13 = smov (!%p37_p0, %s39_s13), %s915_s9 }
  0x12   : > { %1173 = sst [smem:[#allocation14_spill]] %s1191_s12  ;;  %s44_s15 = ssub.s32 %s911_s8, %s1191_s12 }
  0x13   : > { %p1022_p3 = por %p56_p2, %p55_p1  ;;  %p41_p4 = scmp.ge.s32.totalorder %s1193_s13, 2 }
  0x14   : > { %p61_p5 = scmp.ne.s32.totalorder %s895_s27, %s891_s26  ;;  %p62_p6 = scmp.eq.s32.totalorder %s631_s10, 0 }
  0x15   : > { %p220_p7 = scmp.eq.s32.totalorder %s631_s10, 3  ;;  %s1195_s13 = smov (%p41_p4, %s1193_s13), 0 }
  0x16   : > { %1175 = sst [smem:[#allocation15_spill]] %s1195_s13  ;;  %p1030_p8 = por %p62_p6, %p61_p5 }
  0x17   : > { %p1034_p9 = por %p220_p7, %p55_p1  ;;  %s43_s19 = ssub.s32 %s915_s9, %s1195_s13 }
  0x18   : > { %p226_p10 = scmp.eq.s32.totalorder %s632_s11, 3  ;;  %s45_s20 = sor.u32 %s44_s15, %s43_s19 }
  0x19   : > { %p46_p11 = scmp.eq.s32.totalorder %s45_s20, 0  ;;  %p668_p13 = scmp.lt.s32.totalorder %s919_s6, 4 }
  0x1a   : > { %p1040_p12 = por %p226_p10, %p61_p5  ;;  %s261_s22 = sand.u32 1, %s899_s28  }
  0x1b   : > { %s1047_s23 = scalar_select %p46_p11, %s899_s28, %s48_s14  }
  0x1c   : > { %s635_s24 = sshll.u32 %s261_s22, 2  ;;  %s636_s25 = sshll.u32 %s915_s9, 1 }
  0x1d   : > { %s269_s10 = sadd.s32 %s911_s8, %s636_s25  ;;  %s265_s12 = scalar_lea.vmem [#allocation3], %s635_s24 }
  0x1e   : > { %s275_s26 = sshll.u32 %s265_s12, 4  ;;  %s637_s13 = sshll.u32 %s269_s10, 2  ;;  %s276_s26 = int_to_ptr.vmem [resolvable:$true] %s275_s26 }
  0x1f   : > { %s1179_s0 = sld [smem:[#allocation16_spill]]  ;;  %p1056_p0 = pnand %p668_p13, %p1022_p3 }
  0x20   : > { %p641_p1 = scmp.ge.s32.totalorder %s919_s6, 1  ;;  %s262_s9 = scalar_lea.sflag [#allocation4], %s261_s22 }
  0x21   : > { %p301_p2 = scmp.lt.s32.totalorder %s919_s6, 5  ;;  %s292_s10 = scalar_lea.hbm %s1159_s1, %s637_s13 }
  0x22   : > { %s294_s11 = sshll.u32 %s292_s10, 4  ;;  %s286_s16 = scalar_lea.vmem [#allocation6], %s635_s24  ;;  %s295_s11 = int_to_ptr.hbm [resolvable:$true] %s294_s11 }
  0x23   : > { %p302_p4 = pnand %p641_p1, %p301_p2  ;;  %s296_s15 = sshll.u32 %s286_s16, 4  ;;  %s297_s15 = int_to_ptr.vmem [resolvable:$true] %s296_s15 }
  0x25   : > { %s271_s19 = scalar_lea.hbm %s1179_s0, %s637_s13  ;;  %s283_s0 = scalar_lea.sflag [#allocation7], %s261_s22 }
  0x26   : > { %s273_s14 = sshll.u32 %s271_s19, 4  ;;  %305 = sbr.rel (%p302_p4) target bundleno = 283 (0x11b), region = 48  ;;  %s274_s14 = int_to_ptr.hbm [resolvable:$true] %s273_s14 }
  0x27   : > { %660 = dma.hbm_to_vmem [thread:$0]  (!%p1056_p0), %s274_s14, 64, %s276_s26, %s262_s9  }
  0x28   : > { %663 = dma.hbm_to_vmem [thread:$0]  (!%p1056_p0), %s295_s11, 64, %s297_s15, %s283_s0  }
  0x29   : > { %s1070_s19 = sand.u32 (!%p302_p4), 1, %s895_s27  }
  0x2a   : > { %s1073_s26 = sshll.u32 (!%p302_p4), %s1070_s19, 2  ;;  %s308_s9 = scalar_lea.sflag (!%p302_p4), [#allocation4], %s1070_s19 }
  0x2b   : > { %s311_s13 = scalar_lea.vmem [#allocation3], %s1073_s26 }
  0x2c   : > { %878 = dma.done.wait (%p1030_p8), %s308_s9, 64  }
  0x2d   : > { %880 = vsyncadd (%p1030_p8), %s308_s9, 4294967232  ;;  %s318_s0 = scalar_lea.sflag [#allocation7], %s1070_s19  ;;  %s321_s22 = scalar_lea.vmem [#allocation6], %s1073_s26 }
  0x2e   : > { %882 = dma.done.wait (%p1030_p8), %s318_s0, 64  }
  0x2f   : > { %884 = vsyncadd (%p1030_p8), %s318_s0, 4294967232  ;;  %v921_v0 = vmov 0   ;;  %v922_v1 = vmov 1   ;;  %v360_v2 = vld [vmem:[%s1160_s2] sm:$0xf]  ;;  %v923_v5 = vmov 2  }
  0x30   : > { %739 = vset.pattern.permute.xlu0 %v921_v0  ;;  %740 = vset.pattern.permute.xlu1 %v921_v0  ;;  %v377_v3 = vld [vmem:[%s1162_s4] sm:$0xf]  ;;  %v924_v6 = vmov 3   ;;  %v359_v12 = vld [vmem:[%s321_s22] sm:$0xf]  ;;  %v925_v27 = vmov 4.0  }
  0x31   : > { %742 = vset.pattern.permute.xlu2 %v922_v1  ;;  %363 = vperm.xlu0 %739, %v360_v2   ;;  %v368_v4 = vld [vmem:[%s1161_s3] sm:$0xf]  ;;  %v374_v14 = vperm.slane %v359_v12, 0  ;;  %v395_v21 = vperm.slane %v359_v12, 1  ;;  %v409_v26 = vperm.slane %v359_v12, 2  ;;  %749 = vrcp.f32 %v925_v27  ;;  %s479_s16 = sld [smem:[#allocation2]] }
  0x32   : > { %380 = vperm.xlu1 %740, %v377_v3   ;;  %392 = vperm.xlu2 %742, %v368_v4   ;;  %v453_v7 = vld [vmem:[%s1163_s5] sm:$0xf]  ;;  %v423_v34 = vperm.slane %v359_v12, 3  ;;  %vm427_vm0 = vcmask 1043456   ;;  %s647_s15 = sshll.u32 %s907_s30, 1  ;;  %s357_s30 = scalar_lea.vmem [#allocation8], %s1073_s26 }
  0x33   : > { %v1101_v11 = vld [vmem:[%s311_s13] sm:$0xf]  ;;  %s514_s9 = sadd.s32 %s903_s29, %s647_s15  ;;  %s518_s29 = sshll.u32 %s357_s30, 4  ;;  %s519_s29 = int_to_ptr.vmem [resolvable:$true] %s518_s29 }
  0x34   : > { %v366_v13 = vperm.slane %v1101_v11, 0  ;;  %v388_v15 = vperm.slane %v1101_v11, 1  ;;  %v402_v25 = vperm.slane %v1101_v11, 2  ;;  %v416_v30 = vperm.slane %v1101_v11, 3  ;;  %s648_s13 = sshll.u32 %s514_s9, 2  ;;  %s504_s14 = scalar_lea.sflag [#allocation5], %s1070_s19 }
  0x35   : > { %s516_s24 = scalar_lea.hbm %s1165_s7, %s648_s13  ;;  %s837_s17 = scalar_lea.hbm %s1165_s7, 16 }
  0x36   : > { %s520_s20 = sshll.u32 %s516_s24, 4  ;;  %s521_s20 = int_to_ptr.hbm [resolvable:$true] %s520_s20 }
  0x37   : > { %v750_v40 = vpop.eup %749  ;;  %s831_s12 = sshra.s32 %s521_s20, 4  ;;  %s832_s12 = int_to_ptr.hbm [resolvable:$true] %s831_s12 }
  0x38   : > { %v436_v44 = vmul.f32 4.0, %v750_v40  ;;  %vm440_vm1 = vweird.f32 %v750_v40  ;;  %s833_s25 = scalar_lea.hbm %s832_s12, 4  ;;  %p838_p7 = scmp.lt.s32.totalorder %s832_s12, %s1165_s7 }
  0x39   : > { %371 = vperm.xlu0 %739, %v368_v4   ;;  %p834_p3 = scmp.ne.s32.totalorder %s832_s12, %s833_s25  ;;  %p839_p8 = scmp.lt.s32.totalorder %s837_s17, %s833_s25 }
  0x3a   : > { %741 = vset.pattern.permute.xlu1 %v922_v1  ;;  %743 = vset.pattern.permute.xlu2 %v923_v5  ;;  %v437_v47 = vsub.f32 1.0, %v436_v44 }
  0x3b   : > { %385 = vperm.xlu1 %741, %v360_v2   ;;  %399 = vperm.xlu2 %743, %v360_v2   ;;  %p835_p5 = pnand %p834_p3, %p1034_p9  ;;  %p840_p10 = por %p839_p8, %p838_p7 }
  0x3c   : > { %v438_v50 = vmul.f32 %v750_v40, %v437_v47 }
  0x3d   : > { %p836_p6 = pneg %p835_p5 }
  0x3e   : > { %v439_v53 = vadd.f32 %v750_v40, %v438_v50 }
  0x3f   : > { %p841_p11 = pnand %p840_p10, %p836_p6 }
  0x40   : > { %v441_v56 = vsel %vm440_vm1, %v750_v40, %v439_v53 }
  0x41   : > { %744 = vset.pattern.permute.xlu0 %v923_v5 }
  0x42   : > { %406 = vperm.xlu0 %744, %v368_v4  }
  0x43   : > { %745 = vset.pattern.permute.xlu1 %v924_v6  ;;  %746 = vset.pattern.permute.xlu2 %v924_v6 }
  0x44   : > { %413 = vperm.xlu1 %745, %v360_v2   ;;  %420 = vperm.xlu2 %746, %v368_v4  }
  0x4a   : > { %748 = vset.pattern.permute.xlu0 %v921_v0 }
  0x4c   : > { %747 = vset.pattern.permute.xlu1 %v921_v0 }
  0x4d   : > { %456 = vperm.xlu1 %747, %v453_v7  }
  0x8c   : > { %v393_v8 = vpop.permute.xlu2 %392 }
  0x8d   : > { %v396_v28 = vmul.f32 %v395_v21, %v393_v8 }
  0x95   : > { %v400_v17 = vpop.permute.xlu2 %399 }
  0x96   : > { %v403_v32 = vmul.f32 %v402_v25, %v400_v17 }
  0x9e   : > { %v421_v37 = vpop.permute.xlu2 %420 }
  0x9f   : > { %v424_v42 = vmul.f32 %v423_v34, %v421_v37 }
  0xa3   : > { %v364_v9 = vpop.permute.xlu0 %363 }
  0xa4   : > { %v381_v10 = vpop.permute.xlu1 %380  ;;  %v367_v18 = vmul.f32 %v366_v13, %v364_v9 }
  0xab   : > { %v372_v16 = vpop.permute.xlu0 %371 }
  0xac   : > { %v375_v19 = vmul.f32 %v374_v14, %v372_v16 }
  0xad   : > { %v386_v20 = vpop.permute.xlu1 %385 }
  0xae   : > { %v376_v22 = vadd.f32 %v375_v19, %v367_v18  ;;  %v389_v23 = vmul.f32 %v388_v15, %v386_v20 }
  0xb0   : > { %v383_v24 = vadd.f32 %v381_v10, %v376_v22  ;;  %v480_v22 = vstv %s479_s16 }
  0xb2   : > { %v390_v29 = vadd.f32 %v389_v23, %v383_v24 }
  0xb4   : > { %v397_v31 = vadd.f32 %v396_v28, %v390_v29  ;;  %v407_v33 = vpop.permute.xlu0 %406 }
  0xb5   : > { %v410_v35 = vmul.f32 %v409_v26, %v407_v33 }
  0xb6   : > { %v414_v36 = vpop.permute.xlu1 %413  ;;  %v404_v38 = vadd.f32 %v403_v32, %v397_v31 }
  0xb7   : > { %v417_v39 = vmul.f32 %v416_v30, %v414_v36 }
  0xb8   : > { %v411_v41 = vadd.f32 %v410_v35, %v404_v38 }
  0xba   : > { %v418_v43 = vadd.f32 %v417_v39, %v411_v41 }
  0xbc   : > { %v425_v45 = vadd.f32 %v424_v42, %v418_v43 }
  0xbe   : > { %v426_v46 = vmax.f32 %v425_v45, 0.0 }
  0xbf   : > { %v457_v63 = vpop.permute.xlu1 %456 }
  0xc0   : > { %v428_v48 = vsel %vm427_vm0, %v426_v46, 0.0 }
  0xc1   : > { %v429_v49 = vrot.slane %v428_v48, 4 }
  0xc3   : > { %v430_v51 = vadd.f32 %v429_v49, %v428_v48 }
  0xc5   : > { %v431_v52 = vrot.slane %v430_v51, 2 }
  0xc7   : > { %v432_v54 = vadd.f32 %v431_v52, %v430_v51 }
  0xc9   : > { %v433_v55 = vrot.slane %v432_v54, 1 }
  0xcb   : > { %v434_v57 = vadd.f32 %v433_v55, %v432_v54 }
  0xcd   : > { %v442_v58 = vmul.f32 %v441_v56, %v434_v57 }
  0xcf   : > { %v443_v59 = vsub.f32 %v426_v46, %v442_v58 }
  0xd1   : > { %v444_v60 = vmul.f32 %v443_v59, %v443_v59  ;;  %v459_v2 = vmul.f32 %v457_v63, %v443_v59 }
  0xd3   : > { %v445_v61 = vsel %vm427_vm0, %v444_v60, 0.0  ;;  %v460_v5 = vsel %vm427_vm0, %v459_v2, 0.0 }
  0xd4   : > { %v446_v62 = vrot.slane %v445_v61, 4  ;;  %v461_v8 = vrot.slane %v460_v5, 4 }
  0xd6   : > { %v447_v0 = vadd.f32 %v446_v62, %v445_v61  ;;  %v462_v10 = vadd.f32 %v461_v8, %v460_v5 }
  0xd8   : > { %v448_v1 = vrot.slane %v447_v0, 2  ;;  %v463_v12 = vrot.slane %v462_v10, 2 }
  0xda   : > { %v449_v3 = vadd.f32 %v448_v1, %v447_v0  ;;  %v464_v15 = vadd.f32 %v463_v12, %v462_v10 }
  0xdc   : > { %v450_v4 = vrot.slane %v449_v3, 1  ;;  %v465_v18 = vrot.slane %v464_v15, 1 }
  0xde   : > { %v451_v6 = vadd.f32 %v450_v4, %v449_v3  ;;  %v466_v21 = vadd.f32 %v465_v18, %v464_v15 }
  0xe0   : > { %v452_v7 = vmul.f32 %v451_v6, %v441_v56 }
  0xe2   : > { %v467_v9 = vadd.f32 1e-05, %v452_v7 }
  0xe4   : > { %751 = vrsqrt.f32 %v467_v9  ;;  %vm474_vm3 = vweird.f32 %v467_v9 }
  0xea   : > { %v752_v13 = vpop.eup %751 }
  0xeb   : > { %v469_v14 = vmul.f32 %v752_v13, %v467_v9  ;;  %vm475_vm2 = vweird.f32 %v752_v13 }
  0xec   : > { %vm476_vm4 = vmor %vm474_vm3, %vm475_vm2 }
  0xed   : > { %v470_v16 = vmul.f32 %v752_v13, %v469_v14 }
  0xef   : > { %v471_v17 = vmul.f32 0.5, %v470_v16 }
  0xf1   : > { %v472_v19 = vsub.f32 1.5, %v471_v17 }
  0xf3   : > { %v473_v20 = vmul.f32 %v752_v13, %v472_v19 }
  0xf5   : > { %v477_v23 = vsel %vm476_vm4, %v752_v13, %v473_v20 }
  0xf6   : > { %v478_v24 = vmul.f32 %v477_v23, %v466_v21 }
  0xf8   : > { %v481_v25 = vadd.f32 %v480_v22, %v478_v24 }
  0xfa   : > { %v645_v26 = vmul.f32 -1.442695, %v481_v25 }
  0xfc   : > { %753 = vpow2.f32 %v645_v26 }
 0x102   : > { %v754_v27 = vpop.eup %753 }
 0x103   : > { %v485_v28 = vadd.f32 1.0, %v754_v27 }
 0x105   : > { %755 = vrcp.f32 %v485_v28  ;;  %v497_v32 = vand.u32 2147483648, %v485_v28  ;;  %v495_v34 = vand.u32 2147483647, %v485_v28  ;;  %vm491_vm6 = vweird.f32 %v485_v28 }
 0x107   : > { %v498_v36 = vor.u32 1.1754944e-38, %v497_v32  ;;  %vm496_vm8 = vcmp.eq.f32.partialorder %v495_v34, 8.507059e+37 }
 0x10b   : > { %v756_v29 = vpop.eup %755 }
 0x10c   : > { %v487_v30 = vmul.f32 %v756_v29, %v485_v28  ;;  %vm492_vm5 = vweird.f32 %v756_v29 }
 0x10d   : > { %vm493_vm7 = vmor %vm491_vm6, %vm492_vm5 }
 0x10e   : > { %v488_v31 = vsub.f32 1.0, %v487_v30 }
 0x110   : > { %v489_v33 = vmul.f32 %v756_v29, %v488_v31 }
 0x112   : > { %v490_v35 = vadd.f32 %v756_v29, %v489_v33 }
 0x114   : > { %v494_v37 = vsel %vm493_vm7, %v756_v29, %v490_v35 }
 0x115   : > { %v499_v38 = vsel %vm496_vm8, %v498_v36, %v494_v37 }
 0x116   : > { %v501_v39 = vmul.f32 %v499_v38, %v1101_v11 }
 0x118   : > { %502 = vst [vmem:[%s357_s30] sm:$0xf] %v501_v39 }
 0x119   : > { %844 = shalt.err (!%p841_p11)
}
 0x11a   : > { %655 = dma.vmem_to_hbm [thread:$0]  (%p1034_p9), %s519_s29, 64, %s521_s20, %s504_s14  }
 0x11b PF: > { %s1181_s19 = sld [smem:[#allocation12_spill]]  ;;  %p669_p13 = scmp.ge.s32.totalorder %s919_s6, 2 }
 0x11d   : > { %p665_p0 = pnand %p669_p13, %p1040_p12 }
 0x11f   : > { %p666_p1 = pneg %p665_p0 }
 0x121   : > { %s532_s15 = sand.u32 1, %s1181_s19  }
 0x122   : > { %s533_s9 = scalar_lea.sflag [#allocation5], %s532_s15 }
 0x123   : > { %886 = dma.done.wait (%p666_p1), %s533_s9, 64  }
 0x124   : > { %888 = vsyncadd (%p666_p1), %s533_s9, 4294967232  ;;  %s27_s6 = sadd.s32 1, %s919_s6   ;;  %s1182_s30 = sld [smem:[#allocation13_spill]] }
 0x125   : > { %p24_p2 = scmp.ge.s32.totalorder %s27_s6, 6   ;;  %s1183_s18 = sld [smem:[#allocation14_spill]] }
 0x126   : > { %s1184_s9 = sld [smem:[#allocation15_spill]]  ;;  %s1185_s26 = smov %s895_s27 }
 0x127   : > { %s1186_s27 = smov %s899_s28  ;;  %s1187_s28 = smov %s1047_s23 }
 0x128   : > { %s1188_s29 = smov %s911_s8  ;;  %26 = sbr.rel (!%p24_p2) target bundleno = 12 (0xc), region = 106 }
 0x12b   : > { %s1189_s8 = smov %s1183_s18 }
 0x12d   :  { %539 = vsyncpa [#allocation4], 1 }
 0x12e   :  { %541 = vsyncpa [#allocation4 + $0x1], 1 }
 0x12f   :  { %542 = vsyncpa [#allocation7], 1 }
 0x130   :  { %544 = vsyncpa [#allocation7 + $0x1], 1 }
 0x131   :  { %545 = vsyncpa [#allocation5], 1 }
 0x132   :  { %547 = vsyncpa [#allocation5 + $0x1], 1 }

</bundles_post_ra>
